<compile_context>
chip_gen: v5e
topology: v5e:2x2
jax: 0.10.0
libtpu: 0.0.40
codegen_flags: <defaults>
</compile_context>

<pallas_src>
import functools

import jax
import jax.numpy as jnp
from jax.experimental import pallas as pl
from jax.experimental.pallas import tpu as pltpu


def _round_up(n: int, m: int) -> int:
    return ((n + m - 1) // m) * m


def linear_kernel(x_ref, w_ref, b_ref, o_ref):
    # x_ref: (TILE_B, K_pad)   w_ref: (N_pad, K_pad)   b_ref: (1, N_pad)
    # Contract on the last (lane) dim of both operands -> MXU, f32 accumulate.
    acc = jax.lax.dot_general(
        x_ref[...],
        w_ref[...],
        dimension_numbers=(((1,), (1,)), ((), ())),
        preferred_element_type=jnp.float32,
    )  # (TILE_B, N_pad)
    # Single bias add per output tile (plain full-vreg VPU add).
    o_ref[...] = (acc + b_ref[...]).astype(o_ref.dtype)


@functools.partial(jax.jit, static_argnames=("tile_b",))
def linear_forward(x, weight, bias, *, tile_b: int = 512):
    """x: (B, in_features), weight: (out, in) [PyTorch layout], bias: (out,).

    Returns (B, out) = x @ weight.T + bias.
    """
    B, K = x.shape
    N = weight.shape[0]

    # Pad feature dims to lane-dense multiples of 128; pad batch to the tile.
    K_pad = _round_up(max(K, 1), 128)
    N_pad = _round_up(max(N, 1), 128)
    tile_b = min(tile_b, _round_up(B, 8))
    B_pad = _round_up(B, tile_b)

    x_p = jnp.zeros((B_pad, K_pad), x.dtype).at[:B, :K].set(x)
    w_p = jnp.zeros((N_pad, K_pad), weight.dtype).at[:N, :K].set(weight)
    b_p = jnp.zeros((1, N_pad), bias.dtype).at[0, :N].set(bias)

    grid = (B_pad // tile_b,)

    out_padded = pl.pallas_call(
        linear_kernel,
        out_shape=jax.ShapeDtypeStruct((B_pad, N_pad), x.dtype),
        grid_spec=pltpu.PrefetchScalarGridSpec(
            num_scalar_prefetch=0,
            grid=grid,
            in_specs=[
                # x streamed over the batch grid (double-buffered DMA).
                pl.BlockSpec((tile_b, K_pad), lambda i: (i, 0)),
                # Weight and bias stay VMEM-resident across all grid steps.
                pl.BlockSpec((N_pad, K_pad), lambda i: (0, 0)),
                pl.BlockSpec((1, N_pad), lambda i: (0, 0)),
            ],
            out_specs=pl.BlockSpec((tile_b, N_pad), lambda i: (i, 0)),
        ),
        compiler_params=pltpu.CompilerParams(
            dimension_semantics=("parallel",),
        ),
    )(x_p, w_p, b_p)

    # Strip the padding outside the kernel.
    return out_padded[:B, :N]


if __name__ == "__main__":
    # Phishing-website style dims: 30 input features, 2 output classes, batch 8.
    batch, input_size, output_size = 8, 30, 2

    key = jax.random.PRNGKey(0)
    kx, kw, kb = jax.random.split(key, 3)

    # Deterministic init matching nn.Linear's uniform(-1/sqrt(in), 1/sqrt(in)).
    bound = 1.0 / jnp.sqrt(jnp.float32(input_size))
    weight = jax.random.uniform(
        kw, (output_size, input_size), jnp.float32, -bound, bound
    )
    bias = jax.random.uniform(kb, (output_size,), jnp.float32, -bound, bound)

    x = jax.random.normal(kx, (batch, input_size), jnp.float32)

    out = linear_forward(x, weight, bias)
    out = jax.block_until_ready(out)

    # Sanity check against plain JAX reference.
    ref = x @ weight.T + bias
    assert out.shape == (batch, output_size)
    assert jnp.allclose(out, ref, atol=1e-5, rtol=1e-5)

    print("KERNEL_OK")
</pallas_src>

<mosaic_0001>
module attributes {stable_mosaic.version = 11 : i64} {
  func.func @linear_kernel(%arg0: i32, %arg1: memref<8x128xf32, #tpu.memory_space<vmem>>, %arg2: memref<128x128xf32, #tpu.memory_space<vmem>>, %arg3: memref<1x128xf32, #tpu.memory_space<vmem>>, %arg4: memref<8x128xf32, #tpu.memory_space<vmem>>) attributes {dimension_semantics = [#tpu.dimension_semantics<parallel>], iteration_bounds = array<i64: 1>, scalar_prefetch = 0 : i64, scratch_operands = 0 : i64, tpu.core_type = #tpu.core_type<tc>, window_params = [{transform_indices = @transform_0, window_bounds = array<i64: 8, 128>}, {pipeline_mode = #tpu.pipeline_mode<synchronous>, transform_indices = @transform_1, window_bounds = array<i64: 128, 128>}, {pipeline_mode = #tpu.pipeline_mode<synchronous>, transform_indices = @transform_2, window_bounds = array<i64: 1, 128>}, {transform_indices = @transform_3, window_bounds = array<i64: 8, 128>}]} {
    %c0 = arith.constant 0 : index
    %c0_0 = arith.constant 0 : index
    %0 = vector.load %arg1[%c0, %c0_0] : memref<8x128xf32, #tpu.memory_space<vmem>>, vector<8x128xf32>
    %c0_1 = arith.constant 0 : index
    %c0_2 = arith.constant 0 : index
    %1 = vector.load %arg2[%c0_1, %c0_2] : memref<128x128xf32, #tpu.memory_space<vmem>>, vector<128x128xf32>
    %cst = arith.constant dense<0.000000e+00> : vector<8x128xf32>
    %2 = tpu.matmul %0, %1, %cst {dimension_numbers = #tpu.dot_dimension_numbers<[1], [1], [0], [0], [0, 0, 1, 0], [], []>} : vector<8x128xf32>, vector<128x128xf32>, vector<8x128xf32> -> vector<8x128xf32>
    %c0_3 = arith.constant 0 : index
    %c0_4 = arith.constant 0 : index
    %3 = vector.load %arg3[%c0_3, %c0_4] : memref<1x128xf32, #tpu.memory_space<vmem>>, vector<1x128xf32>
    %4 = vector.broadcast %3 : vector<1x128xf32> to vector<8x128xf32>
    %5 = arith.addf %2, %4 : vector<8x128xf32>
    %c0_5 = arith.constant 0 : index
    %c0_6 = arith.constant 0 : index
    %6 = vector.load %arg4[%c0_5, %c0_6] : memref<8x128xf32, #tpu.memory_space<vmem>>, vector<8x128xf32>
    tpu.vector_store %arg4[%c0_5, %c0_6], %5 {strides = array<i32>} : memref<8x128xf32, #tpu.memory_space<vmem>>, vector<8x128xf32>,
    return
  }
  func.func @transform_0(%arg0: i32) -> (i32, i32) {
    %c0_i32 = arith.constant 0 : i32
    %c0_i32_0 = arith.constant 0 : i32
    return %arg0, %c0_i32 : i32, i32
  }
  func.func @transform_1(%arg0: i32) -> (i32, i32) {
    %c0_i32 = arith.constant 0 : i32
    %c0_i32_0 = arith.constant 0 : i32
    %c0_i32_1 = arith.constant 0 : i32
    return %c0_i32, %c0_i32_0 : i32, i32
  }
  func.func @transform_2(%arg0: i32) -> (i32, i32) {
    %c0_i32 = arith.constant 0 : i32
    %c0_i32_0 = arith.constant 0 : i32
    %c0_i32_1 = arith.constant 0 : i32
    return %c0_i32, %c0_i32_0 : i32, i32
  }
  func.func @transform_3(%arg0: i32) -> (i32, i32) {
    %c0_i32 = arith.constant 0 : i32
    %c0_i32_0 = arith.constant 0 : i32
    return %arg0, %c0_i32 : i32, i32
  }
}

</mosaic_0001>

<bundles_post_ra>
// kernel: linear_forward.1
= control target key start
LH: loop header
LB: loop body
LE: loop exit
PB: predicated region body
PF: predicated region fallthrough
CT: control target
= control target key end

     0   :  { %s138_s1 = inlined_call_operand.vmem [shape: f32[128,128], index: 1, kind: input, shape index: {}]   ;;  %s139_s2 = inlined_call_operand.vmem [shape: f32[1,128], index: 2, kind: input, shape index: {}]   ;;  %s140_s0 = inlined_call_operand.vmem [shape: f32[8,128], index: 0, kind: input, shape index: {}]   ;;  %s141_s3 = inlined_call_operand.vmem [shape: f32[8,128], index: 3, kind: output, shape index: {}]  }
   0x1   :  { %v30_v0 = vld [vmem:[%s138_s1 + $0x78] sm:$0xff]  ;;  %v29_v1 = vld [vmem:[%s138_s1 + $0x70] sm:$0xff]  ;;  %v28_v2 = vld [vmem:[%s138_s1 + $0x68] sm:$0xff] }
   0x2   :  { %35 = vmatpush.xpose.msra.mxu0 %v30_v0  ;;  %v27_v3 = vld [vmem:[%s138_s1 + $0x60] sm:$0xff]  ;;  %v26_v4 = vld [vmem:[%s138_s1 + $0x58] sm:$0xff]  ;;  %v25_v5 = vld [vmem:[%s138_s1 + $0x50] sm:$0xff] }
   0x3   :  { %v24_v6 = vld [vmem:[%s138_s1 + $0x48] sm:$0xff]  ;;  %v23_v7 = vld [vmem:[%s138_s1 + $0x40] sm:$0xff]  ;;  %v22_v8 = vld [vmem:[%s138_s1 + $0x38] sm:$0xff] }
   0x4   :  { %v21_v9 = vld [vmem:[%s138_s1 + $0x30] sm:$0xff]  ;;  %v20_v10 = vld [vmem:[%s138_s1 + $0x28] sm:$0xff]  ;;  %v19_v11 = vld [vmem:[%s138_s1 + $0x20] sm:$0xff] }
   0x5   :  { %v18_v12 = vld [vmem:[%s138_s1 + $0x18] sm:$0xff]  ;;  %v17_v13 = vld [vmem:[%s138_s1 + $0x10] sm:$0xff]  ;;  %v16_v14 = vld [vmem:[%s138_s1 + $0x8] sm:$0xff] }
   0x6   :  { %36 = vmatpush.xpose.msra.mxu0 %v29_v1  ;;  %v15_v15 = vld [vmem:[%s138_s1] sm:$0xff] }
   0x7   :  { %v14_v16 = vld [vmem:[%s140_s0] sm:$0xff] }
   0x8   :  { %v60_v17 = vld [vmem:[%s139_s2] ss:$0 sm:$0xff] }
   0xa   :  { %37 = vmatpush.xpose.msra.mxu0 %v28_v2 }
   0xe   :  { %38 = vmatpush.xpose.msra.mxu0 %v27_v3 }
  0x12   :  { %39 = vmatpush.xpose.msra.mxu0 %v26_v4 }
  0x16   :  { %40 = vmatpush.xpose.msra.mxu0 %v25_v5 }
  0x1a   :  { %41 = vmatpush.xpose.msra.mxu0 %v24_v6 }
  0x1e   :  { %42 = vmatpush.xpose.msra.mxu0 %v23_v7 }
  0x22   :  { %43 = vmatpush.xpose.msra.mxu0 %v22_v8 }
  0x26   :  { %44 = vmatpush.xpose.msra.mxu0 %v21_v9 }
  0x2a   :  { %45 = vmatpush.xpose.msra.mxu0 %v20_v10 }
  0x2e   :  { %46 = vmatpush.xpose.msra.mxu0 %v19_v11 }
  0x32   :  { %47 = vmatpush.xpose.msra.mxu0 %v18_v12 }
  0x36   :  { %48 = vmatpush.xpose.msra.mxu0 %v17_v13 }
  0x3a   :  { %49 = vmatpush.xpose.msra.mxu0 %v16_v14 }
  0x3e   :  { %50 = vmatpush.xpose.msra.mxu0 %v15_v15 }
  0x41   :  { %51 = vmatmul.f32.vlgmr.msra.gmra.mxu0 %v14_v16 }
  0xbe   :  { %v52_v18 = vpop.f32.mrf.mxu0 }
  0xbf   :  { %v53_v19 = vadd.f32 %v60_v17, %v52_v18 }
  0xc1   :  { %55 = vst [vmem:[%s141_s3] sm:$0xff] %v53_v19 }

</bundles_post_ra>
